<compile_context>
chip_gen: v7x
topology: tpu7x:2x2x1
jax: 0.10.0
libtpu: 0.0.40
codegen_flags: <defaults>
</compile_context>

<pallas_src>
from collections import OrderedDict
from functools import partial

import numpy as np
import jax
import jax.numpy as jnp
from jax import lax
from jax.experimental import pallas as pl
from jax.experimental.pallas import tpu as pltpu

_C_LANE = 128                         # lane width: class axis padded to this
_SINGLE_BLOCK_MAX_X_BYTES = 4 << 20   # below this, the D-grid's per-step overhead loses
_MIN_VMEM_LIMIT = 32 << 20            # default scoped VMEM
_VMEM_CAP = None


def _round_up(x, m):
    return ((x + m - 1) // m) * m


def _vmem_capacity_bytes():
    """Physical VMEM per TensorCore (64 MiB on v7x, 128 MiB on v5e/v6e)."""
    global _VMEM_CAP
    if _VMEM_CAP is None:
        try:
            _VMEM_CAP = int(pltpu.get_tpu_info().vmem_capacity_bytes)
        except Exception:
            _VMEM_CAP = 64 << 20      # conservative fallback = v7x per-TC size
    return _VMEM_CAP


def _vmem_limit_bytes(need_bytes):
    """Generation-aware scoped-VMEM request: need + ~25% headroom, capped at 3/4 physical."""
    ceiling = (_vmem_capacity_bytes() * 3) // 4
    need = int(need_bytes * 1.25) + (1 << 20)
    return int(max(min(_MIN_VMEM_LIMIT, ceiling), min(need, ceiling)))


# ---------------------------------------------------------------------------
# Kernels
# ---------------------------------------------------------------------------

def _episode_epilogue(d2, labels, qmask, loss_ref, acc_ref, *, n_classes, m_query):
    """Softmax / NLL / argmin epilogue shared by both kernel variants.

    d2:     (N, C_pad) squared euclidean distances (>= 0)
    labels: (N, 1) int32 class position of each row
    qmask:  (N, 1) float32, 1.0 on query rows
    """
    n, c_pad = d2.shape
    col = lax.broadcasted_iota(jnp.int32, (n, c_pad), 1)
    class_mask = col < n_classes
    d2m = jnp.where(class_mask, d2, jnp.float32(1e30))
    row_min = jnp.min(d2m, axis=1, keepdims=True)                    # (N, 1)

    # Reference euclidean_dist applies .sqrt(); keep it on the loss path.
    dist = jnp.sqrt(d2m)                                             # padded cols ~1e15
    dist_min = jnp.sqrt(row_min)
    # max over real classes of (-dist) is exactly -dist_min: the softmax max is
    # reused from the distance minimum, no extra cross-lane max reduce.
    sumexp = jnp.sum(jnp.exp(dist_min - dist), axis=1, keepdims=True)  # padded -> exp(-huge)=0
    lse = jnp.log(sumexp) - dist_min                                 # logsumexp(-dist)

    # NLL at the ground-truth class; log_p never materialised over (N, C_pad).
    picked_dist = jnp.sum(jnp.where(col == labels, dist, 0.0), axis=1, keepdims=True)
    picked_logp = -picked_dist - lse
    inv_m = jnp.float32(1.0 / float(m_query))
    loss_ref[0, 0] = -jnp.sum(qmask * picked_logp) * inv_m

    # Accuracy: argmin of squared distance (== argmax log_p), first-index tie-break.
    y_hat = jnp.min(jnp.where(d2m == row_min, col, jnp.int32(c_pad)),
                    axis=1, keepdims=True)
    hits = (y_hat == labels).astype(jnp.float32) * qmask
    acc_ref[0, 0] = jnp.sum(hits) * inv_m


def _proto_onehot(labr, wscale, c_pad, n):
    """(C_pad, N) prototype-averaging one-hot built in-kernel (1/S on support rows)."""
    row_cls = lax.broadcasted_iota(jnp.int32, (c_pad, n), 0)
    return jnp.where(row_cls == labr, wscale, 0.0)


def _proto_loss_kernel(x_ref, labc_ref, qmask_ref, labr_ref, wscale_ref,
                       loss_ref, acc_ref, *, n_classes, m_query, c_pad, matmul_dtype):
    """Single-block variant: whole episode resident in VMEM (few-shot sizes)."""
    n = x_ref.shape[0]
    x = x_ref[...]                                          # (N, D) f32
    xm = x.astype(matmul_dtype)

    onehot_cn = _proto_onehot(labr_ref[...], wscale_ref[...], c_pad, n)
    # Class prototypes with one MXU matmul: (C_pad, N) @ (N, D) -> (C_pad, D).
    protos = lax.dot_general(onehot_cn.astype(matmul_dtype), xm,
                             (((1,), (0,)), ((), ())),
                             preferred_element_type=jnp.float32)

    # ||x||^2 + ||p||^2 - 2 x.p  (cross term on MXU; norms in f32: cancellation-sensitive).
    x2 = jnp.sum(x * x, axis=1, keepdims=True)              # (N, 1)
    p2 = jnp.transpose(jnp.sum(protos * protos, axis=1, keepdims=True))  # one tiny xpose
    cross = lax.dot_general(xm, protos.astype(matmul_dtype),
                            (((1,), (1,)), ((), ())),
                            preferred_element_type=jnp.float32)          # (N, C_pad)
    d2 = jnp.maximum(x2 + p2 - 2.0 * cross, 0.0)

    _episode_epilogue(d2, labc_ref[...], qmask_ref[...], loss_ref, acc_ref,
                      n_classes=n_classes, m_query=m_query)


def _proto_loss_grid_kernel(x_ref, labc_ref, qmask_ref, labr_ref, wscale_ref,
                            loss_ref, acc_ref, cross_acc, x2_acc, p2_acc, *,
                            n_classes, m_query, c_pad, matmul_dtype):
    """D-axis reduction variant: per-tile prototype slice + accumulators in VMEM."""
    k = pl.program_id(0)
    n = x_ref.shape[0]

    @pl.when(k == 0)
    def _():
        cross_acc[...] = jnp.zeros_like(cross_acc)
        x2_acc[...] = jnp.zeros_like(x2_acc)
        p2_acc[...] = jnp.zeros_like(p2_acc)
        loss_ref[0, 0] = jnp.float32(0.0)
        acc_ref[0, 0] = jnp.float32(0.0)

    x = x_ref[...]                                          # (N, tile_d)
    xm = x.astype(matmul_dtype)

    onehot_cn = _proto_onehot(labr_ref[...], wscale_ref[...], c_pad, n)
    protos = lax.dot_general(onehot_cn.astype(matmul_dtype), xm,
                             (((1,), (0,)), ((), ())),
                             preferred_element_type=jnp.float32)         # (C_pad, tile_d)

    x2_acc[...] += jnp.sum(x * x, axis=1, keepdims=True)                 # (N, 1)
    p2_acc[...] += jnp.sum(protos * protos, axis=1, keepdims=True)       # (C_pad, 1)
    cross_acc[...] += lax.dot_general(xm, protos.astype(matmul_dtype),
                                      (((1,), (1,)), ((), ())),
                                      preferred_element_type=jnp.float32)

    @pl.when(k == pl.num_programs(0) - 1)
    def _():
        d2 = jnp.maximum(x2_acc[...] + jnp.transpose(p2_acc[...]) - 2.0 * cross_acc[...],
                         0.0)
        _episode_epilogue(d2, labc_ref[...], qmask_ref[...], loss_ref, acc_ref,
                          n_classes=n_classes, m_query=m_query)


# ---------------------------------------------------------------------------
# pallas_call wrappers
# ---------------------------------------------------------------------------

@partial(jax.jit, static_argnames=("n_classes", "m_query", "c_pad", "d_block",
                                   "matmul_dtype"))
def _proto_loss_pallas(x, labels_col, qmask_col, labels_row, wscale_row, *,
                       n_classes, m_query, c_pad, d_block, matmul_dtype):
    n_total, d_feat = x.shape
    out_shape = (jax.ShapeDtypeStruct((1, 1), jnp.float32),
                 jax.ShapeDtypeStruct((1, 1), jnp.float32))
    cost = pl.CostEstimate(
        flops=4 * n_total * c_pad * d_feat,            # averaging matmul + cross matmul
        transcendentals=2 * n_total * c_pad,           # sqrt + exp epilogue
        bytes_accessed=n_total * d_feat * 4 + 16 * n_total + 8)

    if d_block is None:
        # Single-block path: everything VMEM-resident (few-shot episode sizes).
        kern = partial(_proto_loss_kernel, n_classes=n_classes, m_query=m_query,
                       c_pad=c_pad, matmul_dtype=matmul_dtype)
        need = (n_total * d_feat * 4                   # x
                + c_pad * n_total * 4                  # in-kernel one-hot
                + c_pad * d_feat * 4                   # prototypes
                + 6 * n_total * c_pad * 4)             # cross/d2/epilogue temporaries
        loss, acc = pl.pallas_call(
            kern,
            out_shape=out_shape,
            in_specs=[pl.BlockSpec(memory_space=pltpu.MemorySpace.VMEM)] * 5,
            out_specs=(pl.BlockSpec(memory_space=pltpu.MemorySpace.SMEM),
                       pl.BlockSpec(memory_space=pltpu.MemorySpace.SMEM)),
            compiler_params=pltpu.CompilerParams(
                vmem_limit_bytes=_vmem_limit_bytes(need)),
            cost_estimate=cost,
        )(x, labels_col, qmask_col, labels_row, wscale_row)
        return loss[0, 0], acc[0, 0]

    # D-axis reduction grid.  Pad features to a multiple of the tile: zero columns
    # contribute nothing to ||x||^2, the prototypes or the cross term.
    d_pad = _round_up(d_feat, d_block)
    if d_pad != d_feat:
        x = jnp.pad(x, ((0, 0), (0, d_pad - d_feat)))
    grid = (d_pad // d_block,)
    kern = partial(_proto_loss_grid_kernel, n_classes=n_classes, m_query=m_query,
                   c_pad=c_pad, matmul_dtype=matmul_dtype)
    need = (2 * n_total * d_block * 4                  # double-buffered x tiles
            + c_pad * n_total * 4                      # in-kernel one-hot
            + c_pad * d_block * 4                      # per-tile prototypes
            + 6 * n_total * c_pad * 4                  # cross acc + epilogue temporaries
            + n_total * 4 + c_pad * 4)
    loss, acc = pl.pallas_call(
        kern,
        out_shape=out_shape,
        grid=grid,
        in_specs=[
            pl.BlockSpec((n_total, d_block), lambda k: (0, k)),
            pl.BlockSpec((n_total, 1), lambda k: (0, 0)),
            pl.BlockSpec((n_total, 1), lambda k: (0, 0)),
            pl.BlockSpec((1, n_total), lambda k: (0, 0)),
            pl.BlockSpec((1, n_total), lambda k: (0, 0)),
        ],
        out_specs=(
            pl.BlockSpec((1, 1), lambda k: (0, 0), memory_space=pltpu.MemorySpace.SMEM),
            pl.BlockSpec((1, 1), lambda k: (0, 0), memory_space=pltpu.MemorySpace.SMEM),
        ),
        scratch_shapes=[
            pltpu.VMEM((n_total, c_pad), jnp.float32),   # cross-term accumulator
            pltpu.VMEM((n_total, 1), jnp.float32),       # ||x||^2 accumulator
            pltpu.VMEM((c_pad, 1), jnp.float32),         # ||p||^2 accumulator
        ],
        compiler_params=pltpu.CompilerParams(
            dimension_semantics=("arbitrary",),
            vmem_limit_bytes=_vmem_limit_bytes(need)),
        cost_estimate=cost,
    )(x, labels_col, qmask_col, labels_row, wscale_row)
    return loss[0, 0], acc[0, 0]


def _choose_d_block(n_total, d_feat, c_pad):
    """None (single block) for small episodes, else the largest D tile that fits."""
    if n_total * d_feat * 4 <= _SINGLE_BLOCK_MAX_X_BYTES:
        return None
    budget = _vmem_capacity_bytes() // 2
    fixed = 7 * n_total * c_pad * 4                    # one-hot + cross acc + epilogue temps
    d_pad128 = _round_up(d_feat, 128)
    for tile in (2048, 1024, 512, 256, 128):
        if tile > d_pad128:
            continue
        if 2 * n_total * tile * 4 + c_pad * tile * 4 + fixed <= budget:
            return tile
    return 128


# ---------------------------------------------------------------------------
# Host-side episode bookkeeping (torch.unique / nonzero equivalents)
# ---------------------------------------------------------------------------

def make_episode_metadata(target, n_support):
    """Build per-episode metadata once (keeps device->host syncs off the hot path).

    Returns (labels_col (N,1) i32, qmask_col (N,1) f32, labels_row (1,N) i32,
             wscale_row (1,N) f32, n_classes, m_query).
    """
    target_np = np.asarray(target if isinstance(target, np.ndarray)
                           else jax.device_get(target))
    classes = np.unique(target_np)
    n_classes = int(len(classes))
    n_total = int(target_np.shape[0])

    labels = np.zeros((n_total,), np.int32)
    qmask = np.ones((n_total,), np.float32)
    wscale = np.zeros((n_total,), np.float32)
    counts = []
    for ci, c in enumerate(classes):
        idx = np.nonzero(target_np == c)[0]
        counts.append(len(idx))
        labels[idx] = ci
        qmask[idx[:n_support]] = 0.0                    # support rows are not queries
        wscale[idx[:n_support]] = 1.0 / float(n_support)
    # The reference assumes the same number of samples (> n_support) per class.
    assert min(counts) == max(counts) and min(counts) > n_support, (
        "prototypical_loss expects an equal number of samples (> n_support) per class")
    m_query = int(qmask.sum())
    return (jnp.asarray(labels.reshape(n_total, 1)),
            jnp.asarray(qmask.reshape(n_total, 1)),
            jnp.asarray(labels.reshape(1, n_total)),
            jnp.asarray(wscale.reshape(1, n_total)),
            n_classes, m_query)


_EPISODE_CACHE = OrderedDict()
_EPISODE_CACHE_MAX = 64               # bounded: many distinct permutations won't leak


def _cached_metadata(target, n_support):
    target_np = np.asarray(target if isinstance(target, np.ndarray)
                           else jax.device_get(target))
    key = (target_np.tobytes(), target_np.dtype.str, int(n_support))
    meta = _EPISODE_CACHE.get(key)
    if meta is None:
        meta = make_episode_metadata(target_np, n_support)
        _EPISODE_CACHE[key] = meta
        while len(_EPISODE_CACHE) > _EPISODE_CACHE_MAX:
            _EPISODE_CACHE.popitem(last=False)
    else:
        _EPISODE_CACHE.move_to_end(key)
    return meta


def prototypical_loss(inputs, target, n_support, dist_type="euclidean",
                      metadata=None, d_block="auto", matmul_dtype=jnp.float32):
    """JAX/Pallas port of PrototypicalLoss.forward (euclidean distance)."""
    assert dist_type == "euclidean"   # TODO(synk): cosine branch not wired
    if metadata is None:
        metadata = _cached_metadata(target, n_support)
    labels_col, qmask_col, labels_row, wscale_row, n_classes, m_query = metadata
    x = jnp.asarray(inputs, jnp.float32)
    n_total, d_feat = x.shape
    c_pad = max(_C_LANE, _round_up(n_classes, _C_LANE))
    if d_block == "auto":
        d_block = _choose_d_block(n_total, d_feat, c_pad)
    return _proto_loss_pallas(x, labels_col, qmask_col, labels_row, wscale_row,
                              n_classes=n_classes, m_query=m_query, c_pad=c_pad,
                              d_block=d_block, matmul_dtype=matmul_dtype)


class PrototypicalLoss:
    """Forward-only port of the PyTorch PrototypicalLoss module."""
    # TODO(synk): training gradients need a custom_vjp or XLA fallback.

    def __init__(self, n_support):
        self.n_support = n_support

    def __call__(self, inputs, target):
        return prototypical_loss(inputs, target, self.n_support)


# ---------------------------------------------------------------------------
# Reference + self-test
# ---------------------------------------------------------------------------

def _numpy_reference(inputs, target, n_support):
    x = np.asarray(inputs, np.float64)
    t = np.asarray(target)
    classes = np.unique(t)
    C = len(classes)
    n_query = int((t == classes[0]).sum()) - n_support
    protos = np.stack(
        [x[np.nonzero(t == c)[0][:n_support]].mean(0) for c in classes])
    q_idx = np.concatenate([np.nonzero(t == c)[0][n_support:] for c in classes])
    q = x[q_idx]
    diff = q[:, None, :] - protos[None, :, :]
    dists = np.sqrt((diff ** 2).sum(-1))
    logits = -dists
    mx = logits.max(1, keepdims=True)
    lse = mx + np.log(np.exp(logits - mx).sum(1, keepdims=True))
    log_p = logits - lse
    labels = np.repeat(np.arange(C), n_query)
    loss = -log_p[np.arange(len(labels)), labels].mean()
    acc = (log_p.argmax(1) == labels).mean()
    return loss, acc


if __name__ == "__main__":
    key = jax.random.PRNGKey(0)
    k1, k2 = jax.random.split(key)

    # Test 1: small few-shot episode -> single-block path.
    n_classes, n_support, n_query, feat = 4, 2, 3, 32
    n_total = n_classes * (n_support + n_query)
    inputs = jax.random.normal(k1, (n_total, feat), dtype=jnp.float32)
    rng = np.random.default_rng(0)
    target_np = rng.permutation(np.repeat(np.arange(n_classes), n_support + n_query))
    target = jnp.asarray(target_np, jnp.int32)

    loss, acc = PrototypicalLoss(n_support)(inputs, target)
    loss = jax.block_until_ready(loss)
    acc = jax.block_until_ready(acc)
    ref_loss, ref_acc = _numpy_reference(np.asarray(inputs), target_np, n_support)
    assert np.allclose(float(loss), ref_loss, rtol=1e-3, atol=1e-3), (float(loss), ref_loss)
    assert np.allclose(float(acc), ref_acc, rtol=1e-3, atol=1e-3), (float(acc), ref_acc)

    # Test 2: larger feature dim, explicitly exercise the D-reduction grid path
    # (d_block=128; D=320 is zero-padded to 384 -> 3 grid steps).
    n_classes2, n_support2, n_query2, feat2 = 5, 3, 4, 320
    n_total2 = n_classes2 * (n_support2 + n_query2)
    inputs2 = jax.random.normal(k2, (n_total2, feat2), dtype=jnp.float32)
    rng2 = np.random.default_rng(1)
    target2_np = rng2.permutation(np.repeat(np.arange(n_classes2), n_support2 + n_query2))
    target2 = jnp.asarray(target2_np, jnp.int32)

    loss2, acc2 = prototypical_loss(inputs2, target2, n_support2, d_block=128)
    loss2 = jax.block_until_ready(loss2)
    acc2 = jax.block_until_ready(acc2)
    ref_loss2, ref_acc2 = _numpy_reference(np.asarray(inputs2), target2_np, n_support2)
    assert np.allclose(float(loss2), ref_loss2, rtol=1e-3, atol=1e-3), (float(loss2), ref_loss2)
    assert np.allclose(float(acc2), ref_acc2, rtol=1e-3, atol=1e-3), (float(acc2), ref_acc2)

    print("KERNEL_OK")
</pallas_src>

<mosaic_0001>
module attributes {stable_mosaic.version = 11 : i64} {
  func.func @_proto_loss_kernel(%arg0: memref<20x32xf32, #tpu.memory_space<vmem>>, %arg1: memref<20x1xi32, #tpu.memory_space<vmem>>, %arg2: memref<20x1xf32, #tpu.memory_space<vmem>>, %arg3: memref<1x20xi32, #tpu.memory_space<vmem>>, %arg4: memref<1x20xf32, #tpu.memory_space<vmem>>, %arg5: memref<1x1xf32, #tpu.memory_space<smem>>, %arg6: memref<1x1xf32, #tpu.memory_space<smem>>) attributes {dimension_semantics = [], scalar_prefetch = 0 : i64, scratch_operands = 0 : i64, tpu.core_type = #tpu.core_type<tc>} {
    %c0 = arith.constant 0 : index
    %c0_0 = arith.constant 0 : index
    %0 = vector.load %arg0[%c0, %c0_0] : memref<20x32xf32, #tpu.memory_space<vmem>>, vector<20x32xf32>
    %c0_1 = arith.constant 0 : index
    %c0_2 = arith.constant 0 : index
    %1 = vector.load %arg3[%c0_1, %c0_2] : memref<1x20xi32, #tpu.memory_space<vmem>>, vector<1x20xi32>
    %c0_3 = arith.constant 0 : index
    %c0_4 = arith.constant 0 : index
    %2 = vector.load %arg4[%c0_3, %c0_4] : memref<1x20xf32, #tpu.memory_space<vmem>>, vector<1x20xf32>
    %3 = tpu.iota {dimensions = array<i32: 0>} : vector<128x20xi32>
    %4 = vector.broadcast %1 : vector<1x20xi32> to vector<128x20xi32>
    %5 = arith.cmpi eq, %3, %4 : vector<128x20xi32>
    %cst = arith.constant 0.000000e+00 : f32
    %6 = vector.shape_cast %2 : vector<1x20xf32> to vector<1x20xf32>
    %7 = vector.broadcast %6 : vector<1x20xf32> to vector<128x20xf32>
    %8 = vector.broadcast %cst : f32 to vector<128x20xf32>
    %9 = arith.select %5, %7, %8 : vector<128x20xi1>, vector<128x20xf32>
    %cst_5 = arith.constant dense<0.000000e+00> : vector<128x32xf32>
    %10 = tpu.matmul %9, %0, %cst_5 {dimension_numbers = #tpu.dot_dimension_numbers<[1], [0], [0], [1], [0, 0, 1, 1], [], []>} : vector<128x20xf32>, vector<20x32xf32>, vector<128x32xf32> -> vector<128x32xf32>
    %11 = arith.mulf %0, %0 : vector<20x32xf32>
    %cst_6 = arith.constant dense<0.000000e+00> : vector<20xf32>
    %12 = vector.multi_reduction <add>, %11, %cst_6 [1] : vector<20x32xf32> to vector<20xf32>
    %13 = vector.shape_cast %12 : vector<20xf32> to vector<20x1xf32>
    %14 = arith.mulf %10, %10 : vector<128x32xf32>
    %cst_7 = arith.constant dense<0.000000e+00> : vector<128xf32>
    %15 = vector.multi_reduction <add>, %14, %cst_7 [1] : vector<128x32xf32> to vector<128xf32>
    %16 = vector.shape_cast %15 : vector<128xf32> to vector<128x1xf32>
    %17 = tpu.transpose %16, [1, 0] : vector<128x1xf32> -> vector<1x128xf32>
    %cst_8 = arith.constant dense<0.000000e+00> : vector<20x128xf32>
    %18 = tpu.matmul %0, %10, %cst_8 {dimension_numbers = #tpu.dot_dimension_numbers<[1], [1], [0], [0], [0, 0, 1, 0], [], []>} : vector<20x32xf32>, vector<128x32xf32>, vector<20x128xf32> -> vector<20x128xf32>
    %19 = vector.broadcast %13 : vector<20x1xf32> to vector<20x128xf32>
    %20 = vector.broadcast %17 : vector<1x128xf32> to vector<20x128xf32>
    %21 = arith.addf %19, %20 : vector<20x128xf32>
    %cst_9 = arith.constant 2.000000e+00 : f32
    %22 = vector.broadcast %cst_9 : f32 to vector<20x128xf32>
    %23 = arith.mulf %22, %18 : vector<20x128xf32>
    %24 = arith.subf %21, %23 : vector<20x128xf32>
    %cst_10 = arith.constant 0.000000e+00 : f32
    %25 = vector.broadcast %cst_10 : f32 to vector<20x128xf32>
    %26 = arith.maximumf %24, %25 : vector<20x128xf32>
    %c0_11 = arith.constant 0 : index
    %c0_12 = arith.constant 0 : index
    %27 = vector.load %arg1[%c0_11, %c0_12] : memref<20x1xi32, #tpu.memory_space<vmem>>, vector<20x1xi32>
    %c0_13 = arith.constant 0 : index
    %c0_14 = arith.constant 0 : index
    %28 = vector.load %arg2[%c0_13, %c0_14] : memref<20x1xf32, #tpu.memory_space<vmem>>, vector<20x1xf32>
    %29 = tpu.iota {dimensions = array<i32: 1>} : vector<20x128xi32>
    %c4_i32 = arith.constant 4 : i32
    %30 = vector.broadcast %c4_i32 : i32 to vector<20x128xi32>
    %31 = arith.cmpi slt, %29, %30 : vector<20x128xi32>
    %cst_15 = arith.constant 1.000000e+30 : f32
    %32 = vector.broadcast %cst_15 : f32 to vector<20x128xf32>
    %33 = arith.select %31, %26, %32 : vector<20x128xi1>, vector<20x128xf32>
    %cst_16 = arith.constant dense<0x7F800000> : vector<20xf32>
    %34 = vector.multi_reduction <minimumf>, %33, %cst_16 [1] : vector<20x128xf32> to vector<20xf32>
    %35 = vector.shape_cast %34 : vector<20xf32> to vector<20x1xf32>
    %36 = math.sqrt %33 : vector<20x128xf32>
    %37 = math.sqrt %35 : vector<20x1xf32>
    %38 = vector.broadcast %37 : vector<20x1xf32> to vector<20x128xf32>
    %39 = arith.subf %38, %36 : vector<20x128xf32>
    %40 = math.exp %39 : vector<20x128xf32>
    %cst_17 = arith.constant dense<0.000000e+00> : vector<20xf32>
    %41 = vector.multi_reduction <add>, %40, %cst_17 [1] : vector<20x128xf32> to vector<20xf32>
    %42 = vector.shape_cast %41 : vector<20xf32> to vector<20x1xf32>
    %43 = math.log %42 : vector<20x1xf32>
    %44 = arith.subf %43, %37 : vector<20x1xf32>
    %45 = vector.broadcast %27 : vector<20x1xi32> to vector<20x128xi32>
    %46 = arith.cmpi eq, %29, %45 : vector<20x128xi32>
    %cst_18 = arith.constant 0.000000e+00 : f32
    %47 = vector.broadcast %cst_18 : f32 to vector<20x128xf32>
    %48 = arith.select %46, %36, %47 : vector<20x128xi1>, vector<20x128xf32>
    %cst_19 = arith.constant dense<0.000000e+00> : vector<20xf32>
    %49 = vector.multi_reduction <add>, %48, %cst_19 [1] : vector<20x128xf32> to vector<20xf32>
    %50 = vector.shape_cast %49 : vector<20xf32> to vector<20x1xf32>
    %cst_20 = arith.constant 0.000000e+00 : f32
    %51 = vector.broadcast %cst_20 : f32 to vector<20x1xf32>
    %52 = arith.subf %51, %50 : vector<20x1xf32>
    %53 = arith.subf %52, %44 : vector<20x1xf32>
    %54 = arith.mulf %28, %53 : vector<20x1xf32>
    %55 = vector.shape_cast %54 : vector<20x1xf32> to vector<1x20x1xf32>
    %cst_21 = arith.constant dense<0.000000e+00> : vector<1xf32>
    %56 = vector.multi_reduction <add>, %55, %cst_21 [1, 2] : vector<1x20x1xf32> to vector<1xf32>
    %57 = vector.shape_cast %56 : vector<1xf32> to vector<1x1x1xf32>
    %58 = vector.extract %57[0, 0, 0] : f32 from vector<1x1x1xf32>
    %cst_22 = arith.constant 0.000000e+00 : f32
    %59 = arith.subf %cst_22, %58 : f32
    %cst_23 = arith.constant 0.0833333358 : f32
    %60 = arith.mulf %59, %cst_23 : f32
    %c0_24 = arith.constant 0 : index
    %c0_25 = arith.constant 0 : index
    %61 = memref.load %arg5[%c0_24, %c0_25] : memref<1x1xf32, #tpu.memory_space<smem>>
    memref.store %60, %arg5[%c0_24, %c0_25] : memref<1x1xf32, #tpu.memory_space<smem>>
    %62 = vector.broadcast %35 : vector<20x1xf32> to vector<20x128xf32>
    %63 = arith.cmpf oeq, %33, %62 : vector<20x128xf32>
    %c128_i32 = arith.constant 128 : i32
    %64 = vector.broadcast %c128_i32 : i32 to vector<20x128xi32>
    %65 = arith.select %63, %29, %64 : vector<20x128xi1>, vector<20x128xi32>
    %cst_26 = arith.constant dense<2147483647> : vector<20xi32>
    %66 = vector.multi_reduction <minsi>, %65, %cst_26 [1] : vector<20x128xi32> to vector<20xi32>
    %67 = vector.shape_cast %66 : vector<20xi32> to vector<20x1xi32>
    %68 = arith.cmpi eq, %67, %27 : vector<20x1xi32>
    %69 = arith.extui %68 : vector<20x1xi1> to vector<20x1xi32>
    %70 = arith.sitofp %69 : vector<20x1xi32> to vector<20x1xf32>
    %71 = arith.mulf %70, %28 : vector<20x1xf32>
    %72 = vector.shape_cast %71 : vector<20x1xf32> to vector<1x20x1xf32>
    %cst_27 = arith.constant dense<0.000000e+00> : vector<1xf32>
    %73 = vector.multi_reduction <add>, %72, %cst_27 [1, 2] : vector<1x20x1xf32> to vector<1xf32>
    %74 = vector.shape_cast %73 : vector<1xf32> to vector<1x1x1xf32>
    %75 = vector.extract %74[0, 0, 0] : f32 from vector<1x1x1xf32>
    %cst_28 = arith.constant 0.0833333358 : f32
    %76 = arith.mulf %75, %cst_28 : f32
    %c0_29 = arith.constant 0 : index
    %c0_30 = arith.constant 0 : index
    %77 = memref.load %arg6[%c0_29, %c0_30] : memref<1x1xf32, #tpu.memory_space<smem>>
    memref.store %76, %arg6[%c0_29, %c0_30] : memref<1x1xf32, #tpu.memory_space<smem>>
    return
  }
}

</mosaic_0001>

<bundles_post_ra>
// kernel: _proto_loss_pallas.1
= control target key start
LH: loop header
LB: loop body
LE: loop exit
PB: predicated region body
PF: predicated region fallthrough
CT: control target
= control target key end

     0   :  { %12 = vsyncpa [#allocation3], 0  ;;  %v29_v2 = vlaneseq  ;;  %s1407_s0 = inlined_call_operand.vmem [shape: f32[20,32], index: 0, kind: input, shape index: {}]   ;;  %s1408_s1 = inlined_call_operand.vmem [shape: s32[20,1], index: 1, kind: input, shape index: {}]   ;;  %s1409_s2 = inlined_call_operand.vmem [shape: f32[20,1], index: 2, kind: input, shape index: {}]   ;;  %s1410_s3 = inlined_call_operand.vmem [shape: s32[1,20], index: 3, kind: input, shape index: {}]   ;;  %s1411_s4 = inlined_call_operand.vmem [shape: f32[1,20], index: 4, kind: input, shape index: {}]   ;;  %s1412_s5 = inlined_call_operand.hbm [shape: f32[1,1], index: 5, kind: output, shape index: {0}]   ;;  %s1413_s6 = inlined_call_operand.hbm [shape: f32[1,1], index: 6, kind: output, shape index: {1}]  }
   0x1   :  { %v1077_v0 = vld [vmem:[%s1407_s0] sm:$0xff]  ;;  %v1082_v1 = vld [vmem:[%s1407_s0 + $0x8] sm:$0xff] }
   0x2   :  { %v938_v3 = vpack.c.bf16 %v1082_v1, %v1077_v0  ;;  %v1089_v4 = vld [vmem:[%s1410_s3] ss:$0 sm:$0xff] }
   0x3   :  { %13 = vsyncpa [#allocation5], 0  ;;  %v1094_v5 = vld [vmem:[%s1407_s0 + $0x10] sm:$0xf]  ;;  %vm137_vm0 = vcmask 1043456   ;;  %v1102_v7 = vshrl.u32 %v29_v2, 7 }
   0x4   :  { %v1099_v6 = vld [vmem:[%s1411_s4] ss:$0 sm:$0xff]  ;;  %939 = vmatprep.subr.bf16.mxu0 %v938_v3  ;;  %vm88_vm1 = vcmask 162816   ;;  %v1033_v39 = vmov 0.0|0.0   ;;  %v1035_v40 = vmov 0.0   ;;  %s1009_s19 = scalar_lea.hbm %s1412_s5, 16 }
   0x5   :  { %941 = vmatpush3.bf16.msra.mxu0 %v938_v3  ;;  %vm50_vm2 = vcmp.eq.s32.totalorder %v1102_v7, %v1089_v4  ;;  %v31_v8 = vadd.s32 8, %v1102_v7  ;;  %v32_v9 = vadd.s32 16, %v1102_v7  ;;  %v33_v10 = vadd.s32 24, %v1102_v7  ;;  %942 = vmatprep.subr.bf16.mxu1 %v1033_v39  ;;  %p1010_p0 = scmp.ne.s32.totalorder %s1412_s5, %s1009_s19  ;;  %p1013_p1 = scmp.lt.u32.totalorder %s1009_s19, %s1412_s5 }
   0x6   :  { %871 = vmatprep.subr.msk.mxu0 %vm137_vm0, %v1094_v5  ;;  %v72_v11 = vsel %vm50_vm2, %v1099_v6, 0.0  ;;  %v34_v12 = vadd.s32 32, %v1102_v7  ;;  %v35_v15 = vadd.s32 40, %v1102_v7  ;;  %v36_v16 = vadd.s32 48, %v1102_v7 }
   0x7   :  { %873 = vmatprep.mubr.msk.f32.mxu0 %vm88_vm1, %v72_v11  ;;  %vm51_vm3 = vcmp.eq.s32.totalorder %v31_v8, %v1089_v4  ;;  %vm52_vm4 = vcmp.eq.s32.totalorder %v32_v9, %v1089_v4  ;;  %vm53_vm5 = vcmp.eq.s32.totalorder %v33_v10, %v1089_v4  ;;  %v37_v19 = vadd.s32 56, %v1102_v7  ;;  %p1015_p2 = pnand %p1013_p1, %p1010_p0 }
   0x8   :  { %v73_v13 = vsel %vm51_vm3, %v1099_v6, 0.0  ;;  %v74_v14 = vsel %vm52_vm4, %v1099_v6, 0.0  ;;  %vm54_vm6 = vcmp.eq.s32.totalorder %v34_v12, %v1089_v4  ;;  %v75_v17 = vsel %vm53_vm5, %v1099_v6, 0.0 }
   0x9   :  { %872 = vmatpush3.msk.msra.mxu0 %vm137_vm0, %v1094_v5  ;;  %v76_v18 = vsel %vm54_vm6, %v1099_v6, 0.0  ;;  %vm55_vm7 = vcmp.eq.s32.totalorder %v35_v15, %v1089_v4  ;;  %vm56_vm8 = vcmp.eq.s32.totalorder %v36_v16, %v1089_v4  ;;  %v38_v20 = vadd.s32 64, %v1102_v7 }
   0xa   :  { %874 = vmatmul.mubr.msk.f32.vlgmr.msra.gmra.mrb[0].mxu0 %vm88_vm1, %v73_v13  ;;  %v77_v21 = vsel %vm55_vm7, %v1099_v6, 0.0  ;;  %v78_v22 = vsel %vm56_vm8, %v1099_v6, 0.0  ;;  %vm57_vm9 = vcmp.eq.s32.totalorder %v37_v19, %v1089_v4  ;;  %v39_v23 = vadd.s32 72, %v1102_v7 }
   0xb   :  { %876 = vmatprep.mubr.msk.f32.mxu0 %vm88_vm1, %v74_v14  ;;  %vm58_vm10 = vcmp.eq.s32.totalorder %v38_v20, %v1089_v4  ;;  %v40_v24 = vadd.s32 80, %v1102_v7  ;;  %v79_v25 = vsel %vm57_vm9, %v1099_v6, 0.0  ;;  %v41_v27 = vadd.s32 88, %v1102_v7 }
   0xc   :  { %v80_v26 = vsel %vm58_vm10, %v1099_v6, 0.0  ;;  %vm59_vm11 = vcmp.eq.s32.totalorder %v39_v23, %v1089_v4  ;;  %v42_v28 = vadd.s32 96, %v1102_v7  ;;  %v43_v31 = vadd.s32 104, %v1102_v7 }
   0xd   :  { %vm60_vm12 = vcmp.eq.s32.totalorder %v40_v24, %v1089_v4  ;;  %v81_v29 = vsel %vm59_vm11, %v1099_v6, 0.0  ;;  %vm61_vm13 = vcmp.eq.s32.totalorder %v41_v27, %v1089_v4  ;;  %v44_v32 = vadd.s32 112, %v1102_v7 }
   0xe   :  { %877 = vmatmul.mubr.msk.f32.gmra.mrb[2].mxu0 %vm88_vm1, %v75_v17  ;;  %v82_v30 = vsel %vm60_vm12, %v1099_v6, 0.0  ;;  %vm62_vm14 = vcmp.eq.s32.totalorder %v42_v28, %v1089_v4  ;;  %v83_v33 = vsel %vm61_vm13, %v1099_v6, 0.0  ;;  %vm63_vm15 = vcmp.eq.s32.totalorder %v43_v31, %v1089_v4 }
   0xf   :  { %879 = vmatprep.mubr.msk.f32.mxu0 %vm88_vm1, %v76_v18  ;;  %v84_v34 = vsel %vm62_vm14, %v1099_v6, 0.0  ;;  %v45_v35 = vadd.s32 120, %v1102_v7  ;;  %vm64_vm2 = vcmp.eq.s32.totalorder %v44_v32, %v1089_v4  ;;  %v85_v36 = vsel %vm63_vm15, %v1099_v6, 0.0 }
  0x10   :  { %v86_v37 = vsel %vm64_vm2, %v1099_v6, 0.0  ;;  %vm1034_vm4 = vmmov 0   ;;  %vm289_vm5 = vcmask 261120  }
  0x11   :  { %vm65_vm3 = vcmp.eq.s32.totalorder %v45_v35, %v1089_v4  ;;  %929 = vmatprep.mubr.msk.f32.mxu1 %vm1034_vm4, %v1035_v40  ;;  %vm1177_vm6 = vmpackc.low %vm289_vm5, %vm289_vm5 }
  0x12   :  { %880 = vmatmul.mubr.msk.f32.gmra.mrb[4].mxu0 %vm88_vm1, %v77_v21  ;;  %v87_v38 = vsel %vm65_vm3, %v1099_v6, 0.0 }
  0x13   :  { %882 = vmatprep.mubr.msk.f32.mxu0 %vm88_vm1, %v78_v22 }
  0x16   :  { %883 = vmatmul.mubr.msk.f32.gmra.mrb[6].mxu0 %vm88_vm1, %v79_v25 }
  0x17   :  { %885 = vmatprep.mubr.msk.f32.mxu0 %vm88_vm1, %v80_v26 }
  0x1a   :  { %886 = vmatmul.mubr.msk.f32.gmra.mrb[8].mxu0 %vm88_vm1, %v81_v29 }
  0x1b   :  { %888 = vmatprep.mubr.msk.f32.mxu0 %vm88_vm1, %v82_v30 }
  0x1e   :  { %889 = vmatmul.mubr.msk.f32.gmra.mrb[10].mxu0 %vm88_vm1, %v83_v33 }
  0x1f   :  { %891 = vmatprep.mubr.msk.f32.mxu0 %vm88_vm1, %v84_v34 }
  0x22   :  { %892 = vmatmul.mubr.msk.f32.gmra.mrb[12].mxu0 %vm88_vm1, %v85_v36 }
  0x23   :  { %894 = vmatprep.mubr.msk.f32.mxu0 %vm88_vm1, %v86_v37  ;;  %v286_v37 = vmul.f32 %v1077_v0, %v1077_v0 }
  0x26   :  { %895 = vmatmul.mubr.msk.f32.gmra.mrb[14].mxu0 %vm88_vm1, %v87_v38  ;;  %vm296_vm1 = vcmask 257024  }
  0xdd   :  { %v875_v41 = vpop.f32.mrb[0].mxu0 }
  0xde   :  { %v207_v42 = vpop.f32.mrb[1].mxu0  ;;  %v301_v46 = vmul.f32 %v875_v41, %v875_v41 }
  0xdf   :  { %v943_v44 = vpack.c.bf16 %v875_v41, %v207_v42  ;;  %v300_v45 = vmul.f32 %v207_v42, %v207_v42  ;;  %v287_v42 = vmul.f32 %v1082_v1, %v1082_v1 }
  0xe0   :  { %v319_v54 = vsel %vm289_vm5, %v301_v46, 0.0 }
  0xe1   :  { %v878_v47 = vpop.f32.mrb[2].mxu0  ;;  %945 = vmatpush3.bf16.xpose.msk.msra.mxu1 %vm1177_vm6, %v943_v44  ;;  %v316_v48 = vsel %vm289_vm5, %v300_v45, 0.0  ;;  %v290_v44 = vsel %vm289_vm5, %v286_v37, 0.0  ;;  %v288_v45 = vmul.f32 %v1094_v5, %v1094_v5  ;;  %v293_v46 = vsel %vm289_vm5, %v287_v42, 0.0 }
  0xe2   :  { %317 = vadd.xlane.f32.xlu0 %v316_v48  ;;  %v217_v49 = vpop.f32.mrb[3].mxu0  ;;  %v303_v50 = vmul.f32 %v878_v47, %v878_v47  ;;  %946 = vmatprep.subr.bf16.mxu1 %v1033_v39  ;;  %v1036_v48 = vmov 0  }
  0xe3   :  { %v302_v51 = vmul.f32 %v217_v49, %v217_v49  ;;  %v947_v52 = vpack.c.bf16 %v878_v47, %v217_v49  ;;  %v297_v47 = vsel %vm296_vm1, %v288_v45, 0.0  ;;  %984 = vset.pattern.permute.xlu0 %v1036_v48  ;;  %v1231_v49 = vld [vmem:[%s1408_s1] sm:$0xff] }
  0xe4   :  { %v325_v53 = vsel %vm289_vm5, %v303_v50, 0.0 }
  0xe5   :  { %326 = vadd.xlane.f32.xlu1 %v325_v53  ;;  %v881_v55 = vpop.f32.mrb[4].mxu0  ;;  %v322_v56 = vsel %vm289_vm5, %v302_v51, 0.0 }
  0xe6   :  { %320 = vadd.xlane.f32.xlu0 %v319_v54  ;;  %v305_v57 = vmul.f32 %v881_v55, %v881_v55  ;;  %v227_v58 = vpop.f32.mrb[5].mxu0 }
  0xe7   :  { %v304_v59 = vmul.f32 %v227_v58, %v227_v58  ;;  %v951_v60 = vpack.c.bf16 %v881_v55, %v227_v58 }
  0xe8   :  { %v331_v63 = vsel %vm289_vm5, %v305_v57, 0.0 }
  0xe9   :  { %949 = vmatpush3.bf16.xpose.msk.msra.mxu1 %vm1177_vm6, %v947_v52  ;;  %323 = vadd.xlane.f32.xlu1 %v322_v56  ;;  %v328_v61 = vsel %vm289_vm5, %v304_v59, 0.0  ;;  %v884_v62 = vpop.f32.mrb[6].mxu0 }
  0xea   :  { %950 = vmatprep.subr.bf16.mxu1 %v1033_v39  ;;  %329 = vadd.xlane.f32.xlu0 %v328_v61  ;;  %v307_v3 = vmul.f32 %v884_v62, %v884_v62  ;;  %v237_v4 = vpop.f32.mrb[7].mxu0 }
  0xeb   :  { %v306_v6 = vmul.f32 %v237_v4, %v237_v4  ;;  %v955_v8 = vpack.c.bf16 %v884_v62, %v237_v4  ;;  %v534_v62 = vsub.s32 0, %v1102_v7 }
  0xec   :  { %v337_v11 = vsel %vm289_vm5, %v307_v3, 0.0 }
  0xed   :  { %332 = vadd.xlane.f32.xlu1 %v331_v63  ;;  %v334_v9 = vsel %vm289_vm5, %v306_v6, 0.0  ;;  %v887_v10 = vpop.f32.mrb[8].mxu0 }
  0xee   :  { %335 = vadd.xlane.f32.xlu0 %v334_v9  ;;  %v309_v12 = vmul.f32 %v887_v10, %v887_v10  ;;  %v247_v13 = vpop.f32.mrb[9].mxu0  ;;  %v1246_v9 = vand.u32 127, %v29_v2 }
  0xef   :  { %v308_v14 = vmul.f32 %v247_v13, %v247_v13  ;;  %v959_v15 = vpack.c.bf16 %v887_v10, %v247_v13 }
  0xf0   :  { %v343_v18 = vsel %vm289_vm5, %v309_v12, 0.0  ;;  %vm556_vm7 = vcmp.lt.s32.totalorder %v1246_v9, 4 }
  0xf1   :  { %953 = vmatpush3.bf16.xpose.msk.msra.mxu1 %vm1177_vm6, %v951_v60  ;;  %338 = vadd.xlane.f32.xlu1 %v337_v11  ;;  %v340_v16 = vsel %vm289_vm5, %v308_v14, 0.0  ;;  %v890_v17 = vpop.f32.mrb[10].mxu0 }
  0xf2   :  { %954 = vmatprep.subr.bf16.mxu1 %v1033_v39  ;;  %341 = vadd.xlane.f32.xlu0 %v340_v16  ;;  %v311_v19 = vmul.f32 %v890_v17, %v890_v17  ;;  %v257_v20 = vpop.f32.mrb[11].mxu0 }
  0xf3   :  { %v310_v21 = vmul.f32 %v257_v20, %v257_v20  ;;  %v963_v22 = vpack.c.bf16 %v890_v17, %v257_v20 }
  0xf4   :  { %v349_v25 = vsel %vm289_vm5, %v311_v19, 0.0 }
  0xf5   :  { %344 = vadd.xlane.f32.xlu1 %v343_v18  ;;  %v346_v23 = vsel %vm289_vm5, %v310_v21, 0.0  ;;  %v893_v24 = vpop.f32.mrb[12].mxu0 }
  0xf6   :  { %347 = vadd.xlane.f32.xlu0 %v346_v23  ;;  %v313_v26 = vmul.f32 %v893_v24, %v893_v24  ;;  %v267_v27 = vpop.f32.mrb[13].mxu0 }
  0xf7   :  { %v312_v28 = vmul.f32 %v267_v27, %v267_v27  ;;  %v967_v29 = vpack.c.bf16 %v893_v24, %v267_v27 }
  0xf8   :  { %v355_v32 = vsel %vm289_vm5, %v313_v26, 0.0 }
  0xf9   :  { %957 = vmatpush3.bf16.xpose.msk.msra.mxu1 %vm1177_vm6, %v955_v8  ;;  %350 = vadd.xlane.f32.xlu1 %v349_v25  ;;  %v352_v30 = vsel %vm289_vm5, %v312_v28, 0.0  ;;  %v896_v31 = vpop.f32.mrb[14].mxu0 }
  0xfa   :  { %958 = vmatprep.subr.bf16.mxu1 %v1033_v39  ;;  %353 = vadd.xlane.f32.xlu0 %v352_v30  ;;  %v315_v33 = vmul.f32 %v896_v31, %v896_v31  ;;  %v277_v34 = vpop.f32.mrb[15].mxu0 }
  0xfb   :  { %v314_v35 = vmul.f32 %v277_v34, %v277_v34  ;;  %v971_v36 = vpack.c.bf16 %v896_v31, %v277_v34 }
  0xfc   :  { %v361_v41 = vsel %vm289_vm5, %v315_v33, 0.0 }
  0xfd   :  { %356 = vadd.xlane.f32.xlu1 %v355_v32  ;;  %v358_v38 = vsel %vm289_vm5, %v314_v35, 0.0 }
  0xfe   :  { %359 = vadd.xlane.f32.xlu0 %v358_v38 }
 0x101   :  { %961 = vmatpush3.bf16.xpose.msk.msra.mxu1 %vm1177_vm6, %v959_v15  ;;  %362 = vadd.xlane.f32.xlu1 %v361_v41 }
 0x102   :  { %962 = vmatprep.subr.bf16.mxu1 %v1033_v39  ;;  %291 = vadd.xlane.f32.xlu0 %v290_v44 }
 0x105   :  { %294 = vadd.xlane.f32.xlu1 %v293_v46 }
 0x106   :  { %298 = vadd.xlane.f32.xlu0 %v297_v47 }
 0x109   :  { %965 = vmatpush3.bf16.xpose.msk.msra.mxu1 %vm1177_vm6, %v963_v22 }
 0x10a   :  { %966 = vmatprep.subr.bf16.mxu1 %v1033_v39 }
 0x111   :  { %969 = vmatpush3.bf16.xpose.msk.msra.mxu1 %vm1177_vm6, %v967_v29  ;;  %v1265_v29 = vld [vmem:[%s1408_s1 + $0x8] sm:$0xff] }
 0x112   :  { %970 = vmatprep.subr.bf16.mxu1 %v1033_v39 }
 0x119   :  { %973 = vmatpush3.bf16.xpose.msk.msra.mxu1 %vm1177_vm6, %v971_v36 }
 0x11c   :  { %635 = vperm.xlu0 %984, %v1231_v49  }
 0x120   :  { %930 = vmatmul.mubr.msk.f32.vlgmr.msra.gmra.mrb[0].mxu1 %vm289_vm5, %v1077_v0 }
 0x121   :  { %932 = vmatprep.mubr.msk.f32.mxu1 %vm1034_vm4, %v1035_v40 }
 0x124   :  { %933 = vmatmul.mubr.msk.f32.gmra.mrb[2].mxu1 %vm289_vm5, %v1082_v1 }
 0x125   :  { %935 = vmatprep.mubr.msk.f32.mxu1 %vm1034_vm4, %v1035_v40 }
 0x128   :  { %936 = vmatmul.mubr.msk.f32.gmra.mrb[4].mxu1 %vm289_vm5, %v1094_v5 }
 0x16f   :  { %v318_v39 = vpop.xlane.xlu0 %317 }
 0x170   :  { %364 = vxpose.xlu1.b32.start [1/16] (narrow) %v318_v39, 8 }
 0x172   :  { %v327_v43 = vpop.xlane.xlu1 %326 }
 0x173   :  { %v321_v50 = vpop.xlane.xlu0 %320 }
 0x174   :  { %365 = vxpose.xlu1.b32.cont [2/16] (narrow) %v321_v50, 8 }
 0x176   :  { %v324_v51 = vpop.xlane.xlu1 %323 }
 0x177   :  { %v330_v0 = vpop.xlane.xlu0 %329 }
 0x178   :  { %366 = vxpose.xlu1.b32.cont [3/16] (narrow) %v324_v51, 8 }
 0x17a   :  { %v333_v52 = vpop.xlane.xlu1 %332 }
 0x17b   :  { %v336_v53 = vpop.xlane.xlu0 %335 }
 0x17c   :  { %367 = vxpose.xlu1.b32.cont [4/16] (narrow) %v327_v43, 8 }
 0x17e   :  { %v339_v1 = vpop.xlane.xlu1 %338 }
 0x17f   :  { %v342_v54 = vpop.xlane.xlu0 %341 }
 0x180   :  { %368 = vxpose.xlu1.b32.cont [5/16] (narrow) %v330_v0, 8 }
 0x182   :  { %v345_v55 = vpop.xlane.xlu1 %344 }
 0x183   :  { %v348_v5 = vpop.xlane.xlu0 %347 }
 0x184   :  { %369 = vxpose.xlu1.b32.cont [6/16] (narrow) %v333_v52, 8 }
 0x186   :  { %v351_v56 = vpop.xlane.xlu1 %350 }
 0x187   :  { %v354_v57 = vpop.xlane.xlu0 %353 }
 0x188   :  { %370 = vxpose.xlu1.b32.cont [7/16] (narrow) %v336_v53, 8 }
 0x18a   :  { %v357_v58 = vpop.xlane.xlu1 %356 }
 0x18b   :  { %v360_v59 = vpop.xlane.xlu0 %359 }
 0x18c   :  { %371 = vxpose.xlu1.b32.cont [8/16] (narrow) %v339_v1, 8 }
 0x18e   :  { %v363_v60 = vpop.xlane.xlu1 %362 }
 0x18f   :  { %v292_v4 = vpop.xlane.xlu0 %291 }
 0x190   :  { %372 = vxpose.xlu1.b32.cont [9/16] (narrow) %v342_v54, 8 }
 0x192   :  { %v295_v61 = vpop.xlane.xlu1 %294 }
 0x193   :  { %v299_v18 = vpop.xlane.xlu0 %298 }
 0x194   :  { %373 = vxpose.xlu1.b32.cont [10/16] (narrow) %v345_v55, 8 }
 0x198   :  { %374 = vxpose.xlu1.b32.cont [11/16] (narrow) %v348_v5, 8  ;;  %v1313_v5 = vld [vmem:[%s1408_s1 + $0x10] sm:$0xf] }
 0x19b   :  { %v1268_v30 = vpop.permute.xlu0 %635 }
 0x19c   :  { %375 = vxpose.xlu1.b32.cont [12/16] (narrow) %v351_v56, 8 }
 0x1a0   :  { %376 = vxpose.xlu1.b32.cont [13/16] (narrow) %v354_v57, 8 }
 0x1a4   :  { %377 = vxpose.xlu1.b32.cont [14/16] (narrow) %v357_v58, 8 }
 0x1a8   :  { %378 = vxpose.xlu1.b32.cont [15/16] (narrow) %v360_v59, 8 }
 0x1ac   :  { %379 = vxpose.xlu1.b32.end [16/16] (narrow) %v363_v60, 8 }
 0x1f0   :  { %v380_v63 = vpop.trf.xlu1 }
 0x1f1   :  { %v535_v3 = vrot.slane %v380_v63, %v534_v62 }
 0x1f3   :  { %v536_v6 = vadd.f32 %v535_v3, %v292_v4  ;;  %v518_v8 = vpop.f32.mrb[0].mxu1  ;;  %v537_v15 = vadd.f32 %v535_v3, %v295_v61  ;;  %v538_v2 = vadd.f32 %v535_v3, %v299_v18 }
 0x1f4   :  { %v539_v10 = vmul.f32 2.0, %v518_v8  ;;  %v931_v11 = vpop.f32.mrb[1].mxu1 }
 0x1f6   :  { %v542_v12 = vsub.f32 %v536_v6, %v539_v10 }
 0x1f7   :  { %v523_v13 = vpop.f32.mrb[2].mxu1 }
 0x1f8   :  { %v545_v14 = vmax.f32 %v542_v12, 0.0  ;;  %v540_v16 = vmul.f32 2.0, %v523_v13  ;;  %v934_v17 = vpop.f32.mrb[3].mxu1 }
 0x1fa   :  { %v1251_v7 = vsel %vm556_vm7, %v545_v14, 1e+30  ;;  %v543_v19 = vsub.f32 %v537_v15, %v540_v16 }
 0x1fb   :  { %v528_v20 = vpop.f32.mrb[4].mxu1  ;;  %560 = vmin.xlane.f32.xlu0 %v1251_v7  ;;  %vm569_vm2 = vcmp.eq.f32.partialorder %v1251_v7, inf  ;;  %v572_v11 = vand.u32 2147483648, %v1251_v7  ;;  %vm571_vm5 = vcmp.eq.f32.partialorder %v1251_v7, 0.0 }
 0x1fc   :  { %v546_v21 = vmax.f32 %v543_v19, 0.0  ;;  %v541_v22 = vmul.f32 2.0, %v528_v20  ;;  %v937_v23 = vpop.f32.mrb[5].mxu1 }
 0x1fe   :  { %v1256_v24 = vsel %vm556_vm7, %v546_v21, 1e+30  ;;  %v544_v25 = vsub.f32 %v538_v2, %v541_v22 }
 0x1ff   :  { %562 = vmin.xlane.f32.xlu0 %v1256_v24  ;;  %vm576_vm6 = vcmp.eq.f32.partialorder %v1256_v24, inf  ;;  %v579_v18 = vand.u32 2147483648, %v1256_v24 }
 0x200   :  { %v547_v26 = vmax.f32 %v544_v25, 0.0 }
 0x202   :  { %v559_v27 = vsel %vm556_vm7, %v547_v26, 1e+30  ;;  %vm578_vm7 = vcmp.eq.f32.partialorder %v1256_v24, 0.0 }
 0x203   :  { %v564_v28 = vsel %vm137_vm0, %v559_v27, inf  ;;  %985 = vrsqrt.f32 %v559_v27  ;;  %vm583_vm11 = vcmp.eq.f32.partialorder %v559_v27, inf  ;;  %v586_v0 = vand.u32 2147483648, %v559_v27 }
 0x204   :  { %565 = vmin.xlane.f32.xlu0 %v564_v28  ;;  %vm585_vm14 = vcmp.eq.f32.partialorder %v559_v27, 0.0 }
 0x20d   :  { %v986_v45 = vpop.eup %985 }
 0x20e   :  { %v582_v48 = vmul.f32 %v986_v45, %v559_v27 }
 0x210   :  { %v584_v50 = vsel %vm583_vm11, %v559_v27, %v582_v48 }
 0x211   :  { %v1300_v53 = vsel %vm585_vm14, %v586_v0, %v584_v50  ;;  %vm669_vm14 = vcmask 3072  }
 0x21a   :  { %638 = vperm.xlu0 %984, %v1265_v29  }
 0x288   :  { %v1270_v31 = vpop.xlane.xlu0 %560 }
 0x289   :  { %vm685_vm8 = vcmp.eq.f32.partialorder %v1251_v7, %v1270_v31  ;;  %vm590_vm15 = vcmp.eq.f32.partialorder %v1270_v31, inf  ;;  %v593_v6 = vand.u32 2147483648, %v1270_v31  ;;  %vm592_vm3 = vcmp.eq.f32.partialorder %v1270_v31, 0.0 }
 0x28a   :  { %v1275_v32 = vsel %vm685_vm8, %v1246_v9, 128  ;;  %vm643_vm8 = vcmp.eq.s32.totalorder %v1246_v9, %v1268_v30 }
 0x28b   :  { %v692_v33 = vshra.s32 %v1275_v32, 16 }
 0x28c   :  { %v1278_v34 = vpop.xlane.xlu0 %562 }
 0x28d   :  { %v1280_v35 = vcvt.s32.f32 %v692_v33  ;;  %vm686_vm9 = vcmp.eq.f32.partialorder %v1256_v24, %v1278_v34  ;;  %vm597_vm4 = vcmp.eq.f32.partialorder %v1278_v34, inf  ;;  %v600_v14 = vand.u32 2147483648, %v1278_v34 }
 0x28e   :  { %v1286_v36 = vsel %vm686_vm9, %v1246_v9, 128  ;;  %vm599_vm1 = vcmp.eq.f32.partialorder %v1278_v34, 0.0 }
 0x28f   :  { %695 = vmin.xlane.f32.xlu0 %v1280_v35  ;;  %v706_v37 = vshra.s32 %v1286_v36, 16 }
 0x291   :  { %v566_v38 = vpop.xlane.xlu0 %565  ;;  %v1289_v41 = vcvt.s32.f32 %v706_v37 }
 0x292   :  { %987 = vrsqrt.f32 %v566_v38  ;;  %vm687_vm10 = vcmp.eq.f32.partialorder %v559_v27, %v566_v38  ;;  %vm604_vm12 = vcmp.eq.f32.partialorder %v566_v38, inf  ;;  %v607_v51 = vand.u32 2147483648, %v566_v38 }
 0x293   :  { %v690_v42 = vsel %vm687_vm10, %v1246_v9, 128  ;;  %709 = vmin.xlane.f32.xlu0 %v1289_v41  ;;  %vm606_vm13 = vcmp.eq.f32.partialorder %v566_v38, 0.0  ;;  %989 = vrsqrt.f32 %v1270_v31 }
 0x294   :  { %v1294_v44 = vsel %vm137_vm0, %v690_v42, 2147483647  ;;  %v705_v42 = vand.u32 65535, %v1286_v36 }
 0x295   :  { %v721_v46 = vshra.s32 %v1294_v44, 16 }
 0x297   :  { %v1297_v47 = vcvt.s32.f32 %v721_v46  ;;  %v707_v46 = vcvt.s32.f32 %v705_v42 }
 0x299   :  { %724 = vmin.xlane.f32.xlu0 %v1297_v47  ;;  %v639_v25 = vpop.permute.xlu0 %638 }
 0x29a   :  { %vm644_vm9 = vcmp.eq.s32.totalorder %v1246_v9, %v639_v25 }
 0x29c   :  { %v988_v39 = vpop.eup %987 }
 0x29d   :  { %v603_v43 = vmul.f32 %v988_v39, %v566_v38  ;;  %v990_v56 = vpop.eup %989 }
 0x29e   :  { %v589_v60 = vmul.f32 %v990_v56, %v1270_v31 }
 0x29f   :  { %v605_v52 = vsel %vm604_vm12, %v566_v38, %v603_v43 }
 0x2a0   :  { %v1302_v1 = vsel %vm606_vm13, %v607_v51, %v605_v52  ;;  %v591_v4 = vsel %vm590_vm15, %v1270_v31, %v589_v60 }
 0x2a1   :  { %v611_v54 = vsub.f32 %v1302_v1, %v1300_v53  ;;  %v1329_v12 = vsel %vm592_vm3, %v593_v6, %v591_v4 }
 0x2a3   :  { %v616_v55 = vmul.f32 1.442695, %v611_v54 }
 0x2a5   :  { %991 = vpow2.f32 %v616_v55 }
 0x2a6   :  { %993 = vrsqrt.f32 %v1251_v7 }
 0x2a7   :  { %995 = vrsqrt.f32 %v1278_v34 }
 0x2a8   :  { %997 = vrsqrt.f32 %v1256_v24 }
 0x2af   :  { %v992_v57 = vpop.eup %991  ;;  %641 = vperm.xlu0 %984, %v1313_v5  }
 0x2b0   :  { %v622_v58 = vsel %vm137_vm0, %v992_v57, 0.0  ;;  %v994_v59 = vpop.eup %993 }
 0x2b1   :  { %623 = vadd.xlane.f32.xlu1 %v622_v58  ;;  %v996_v61 = vpop.eup %995  ;;  %v568_v62 = vmul.f32 %v994_v59, %v1251_v7  ;;  %v552_v58 = vld [vmem:[%s1409_s2 + $0x8] sm:$0xff] }
 0x2b2   :  { %v998_v63 = vpop.eup %997  ;;  %v596_v3 = vmul.f32 %v996_v61, %v1278_v34  ;;  %v551_v61 = vld [vmem:[%s1409_s2] sm:$0xff] }
 0x2b3   :  { %v570_v8 = vsel %vm569_vm2, %v1251_v7, %v568_v62  ;;  %v575_v10 = vmul.f32 %v998_v63, %v1256_v24 }
 0x2b4   :  { %v598_v13 = vsel %vm597_vm4, %v1278_v34, %v596_v3  ;;  %v573_v15 = vsel %vm571_vm5, %v572_v11, %v570_v8  ;;  %v691_v34 = vand.u32 65535, %v1275_v32 }
 0x2b5   :  { %v609_v16 = vsub.f32 %v1329_v12, %v573_v15  ;;  %v577_v17 = vsel %vm576_vm6, %v1256_v24, %v575_v10  ;;  %v601_v19 = vsel %vm599_vm1, %v600_v14, %v598_v13  ;;  %v646_v26 = vsel %vm643_vm8, %v573_v15, 0.0  ;;  %v553_v10 = vld [vmem:[%s1409_s2 + $0x10] sm:$0xf] }
 0x2b6   :  { %v580_v20 = vsel %vm578_vm7, %v579_v18, %v577_v17  ;;  %v693_v38 = vcvt.s32.f32 %v691_v34 }
 0x2b7   :  { %v612_v7 = vmul.f32 1.442695, %v609_v16  ;;  %v610_v2 = vsub.f32 %v601_v19, %v580_v20  ;;  %v647_v27 = vsel %vm644_vm9, %v580_v20, 0.0 }
 0x2b9   :  { %999 = vpow2.f32 %v612_v7  ;;  %v614_v21 = vmul.f32 1.442695, %v610_v2 }
 0x2bb   :  { %1001 = vpow2.f32 %v614_v21 }
 0x2c3   :  { %v1000_v22 = vpop.eup %999 }
 0x2c5   :  { %v1002_v23 = vpop.eup %1001 }
 0x2ce   :  { %618 = vadd.xlane.f32.xlu0 %v1000_v22 }
 0x2d2   :  { %620 = vadd.xlane.f32.xlu0 %v1002_v23 }
 0x2d6   :  { %649 = vadd.xlane.f32.xlu0 %v646_v26 }
 0x2da   :  { %651 = vadd.xlane.f32.xlu0 %v647_v27 }
 0x31c   :  { %v696_v24 = vpop.xlane.xlu0 %695 }
 0x31d   :  { %vm697_vm11 = vcmp.eq.f32.partialorder %v1280_v35, %v696_v24  ;;  %v702_v63 = vcvt.f32.s32 %v696_v24 }
 0x31e   :  { %v698_v45 = vsel %vm697_vm11, %v693_v38, inf }
 0x31f   :  { %v703_v13 = vshll.u32 %v702_v63, 16 }
 0x320   :  { %v1343_v28 = vpop.xlane.xlu0 %709 }
 0x321   :  { %vm711_vm12 = vcmp.eq.f32.partialorder %v1289_v41, %v1343_v28  ;;  %v716_v15 = vcvt.f32.s32 %v1343_v28 }
 0x322   :  { %v712_v48 = vsel %vm711_vm12, %v707_v46, inf }
 0x323   :  { %v717_v21 = vshll.u32 %v716_v15, 16 }
 0x326   :  { %v1345_v31 = vpop.xlane.xlu0 %724 }
 0x327   :  { %vm726_vm13 = vcmp.eq.f32.partialorder %v1297_v47, %v1345_v31  ;;  %v731_v22 = vcvt.f32.s32 %v1345_v31 }
 0x329   :  { %v732_v24 = vshll.u32 %v731_v22, 16 }
 0x32e   :  { %v642_v33 = vpop.permute.xlu0 %641 }
 0x32f   :  { %vm645_vm10 = vcmp.eq.s32.totalorder %v1246_v9, %v642_v33  ;;  %v720_v9 = vand.u32 65535, %v1294_v44 }
 0x330   :  { %v648_v30 = vsel %vm645_vm10, %v1300_v53, 0.0 }
 0x331   :  { %v653_v37 = vsel %vm137_vm0, %v648_v30, 0.0  ;;  %v722_v32 = vcvt.s32.f32 %v720_v9  ;;  %vm665_vm0 = vcmask 7168  }
 0x332   :  { %654 = vadd.xlane.f32.xlu0 %v653_v37 }
 0x333   :  { %v727_v39 = vsel %vm726_vm13, %v722_v32, inf }
 0x336   :  { %699 = vmin.xlane.f32.xlu0 %v698_v45 }
 0x33a   :  { %713 = vmin.xlane.f32.xlu0 %v712_v48 }
 0x33e   :  { %728 = vmin.xlane.f32.xlu0 %v727_v39  ;;  %v624_v36 = vpop.xlane.xlu1 %623 }
 0x35b   :  { %v619_v35 = vpop.xlane.xlu0 %618 }
 0x35f   :  { %v621_v43 = vpop.xlane.xlu0 %620 }
 0x360   :  { %1003 = vlog2.f32 %v621_v43 }
 0x361   :  { %1005 = vlog2.f32 %v619_v35 }
 0x362   :  { %1007 = vlog2.f32 %v624_v36 }
 0x363   :  { %v650_v51 = vpop.xlane.xlu0 %649 }
 0x364   :  { %v656_v56 = vsub.f32 0.0, %v650_v51 }
 0x367   :  { %v652_v44 = vpop.xlane.xlu0 %651 }
 0x368   :  { %v657_v55 = vsub.f32 0.0, %v652_v44 }
 0x36a   :  { %v1004_v50 = vpop.eup %1003 }
 0x36b   :  { %v1006_v41 = vpop.eup %1005  ;;  %v628_v0 = vmul.f32 0.6931472, %v1004_v50 }
 0x36c   :  { %v626_v52 = vmul.f32 0.6931472, %v1006_v41  ;;  %v1008_v47 = vpop.eup %1007 }
 0x36d   :  { %v632_v53 = vsub.f32 %v628_v0, %v601_v19  ;;  %v630_v59 = vmul.f32 0.6931472, %v1008_v47 }
 0x36e   :  { %v631_v54 = vsub.f32 %v626_v52, %v1329_v12 }
 0x36f   :  { %v660_v57 = vsub.f32 %v657_v55, %v632_v53  ;;  %v633_v6 = vsub.f32 %v630_v59, %v1302_v1 }
 0x370   :  { %v659_v60 = vsub.f32 %v656_v56, %v631_v54 }
 0x371   :  { %v663_v62 = vmul.f32 %v660_v57, %v552_v58 }
 0x372   :  { %v662_v4 = vmul.f32 %v659_v60, %v551_v61 }
 0x373   :  { %v667_v12 = vsel %vm665_vm0, %v663_v62, 0.0 }
 0x374   :  { %v666_v18 = vsel %vm665_vm0, %v662_v4, 0.0 }
 0x375   :  { %v668_v19 = vadd.f32 %v667_v12, %v666_v18 }
 0x3bf   :  { %v655_v3 = vpop.xlane.xlu0 %654 }
 0x3c0   :  { %v658_v8 = vsub.f32 0.0, %v655_v3 }
 0x3c2   :  { %v661_v11 = vsub.f32 %v658_v8, %v633_v6 }
 0x3c3   :  { %v700_v14 = vpop.xlane.xlu0 %699 }
 0x3c4   :  { %v701_v16 = vcvt.f32.s32 %v700_v14  ;;  %v664_v17 = vmul.f32 %v661_v11, %v553_v10 }
 0x3c6   :  { %v704_v1 = vadd.s32 %v703_v13, %v701_v16  ;;  %v670_v20 = vsel %vm669_vm14, %v664_v17, 0.0 }
 0x3c7   :  { %v714_v7 = vpop.xlane.xlu0 %713  ;;  %v671_v2 = vadd.f32 %v670_v20, %v668_v19 }
 0x3c8   :  { %vm734_vm15 = vcmp.eq.s32.totalorder %v704_v1, %v1231_v49  ;;  %v715_v23 = vcvt.f32.s32 %v714_v7 }
 0x3c9   :  { %v826_v25 = vsel %vm734_vm15, 1.0, %v1035_v40  ;;  %672 = vadd.xlane.f32.xlu0 %v671_v2 }
 0x3ca   :  { %v718_v26 = vadd.s32 %v717_v21, %v715_v23  ;;  %v743_v33 = vmul.f32 %v826_v25, %v551_v61 }
 0x3cb   :  { %v729_v27 = vpop.xlane.xlu0 %728 }
 0x3cc   :  { %vm735_vm2 = vcmp.eq.s32.totalorder %v718_v26, %v1265_v29  ;;  %v730_v28 = vcvt.f32.s32 %v729_v27  ;;  %v746_v31 = vsel %vm665_vm0, %v743_v33, 0.0 }
 0x3cd   :  { %v827_v34 = vsel %vm735_vm2, 1.0, %v1035_v40 }
 0x3ce   :  { %v733_v30 = vadd.s32 %v732_v24, %v730_v28  ;;  %v744_v37 = vmul.f32 %v827_v34, %v552_v58 }
 0x3d0   :  { %vm736_vm3 = vcmp.eq.s32.totalorder %v733_v30, %v1313_v5  ;;  %v747_v49 = vsel %vm665_vm0, %v744_v37, 0.0 }
 0x3d1   :  { %v828_v38 = vsel %vm736_vm3, 1.0, %v1035_v40  ;;  %v748_v42 = vadd.f32 %v747_v49, %v746_v31 }
 0x3d2   :  { %v745_v45 = vmul.f32 %v828_v38, %v553_v10 }
 0x3d4   :  { %v749_v46 = vsel %vm669_vm14, %v745_v45, 0.0 }
 0x3d5   :  { %v750_v9 = vadd.f32 %v749_v46, %v748_v42 }
 0x3d7   :  { %751 = vadd.xlane.f32.xlu0 %v750_v9 }
 0x456   :  { %v673_v29 = vpop.xlane.xlu0 %672 }
 0x457   :  { %v674_v48 = vrot.slane %v673_v29, 4 }
 0x459   :  { %v675_v32 = vadd.f32 %v674_v48, %v673_v29 }
 0x45b   :  { %v676_v39 = vrot.slane %v675_v32, 2 }
 0x45d   :  { %v677_v35 = vadd.f32 %v676_v39, %v675_v32 }
 0x45f   :  { %v678_v43 = vrot.slane %v677_v35, 1 }
 0x461   :  { %v679_v36 = vadd.f32 %v678_v43, %v677_v35 }
 0x463   :  { %974 = vpush %v679_v36 }
 0x464   :  { %v752_v5 = vpop.xlane.xlu0 %751 }
 0x465   :  { %v753_v50 = vrot.slane %v752_v5, 4 }
 0x467   :  { %v754_v51 = vadd.f32 %v753_v50, %v752_v5 }
 0x469   :  { %v755_v41 = vrot.slane %v754_v51, 2 }
 0x46b   :  { %v756_v0 = vadd.f32 %v755_v41, %v754_v51 }
 0x46d   :  { %v757_v40 = vrot.slane %v756_v0, 1 }
 0x46f   :  { %v758_v52 = vadd.f32 %v757_v40, %v756_v0 }
 0x471   :  { %976 = vpush %v758_v52 }
 0x494   :  { %s975_s2 = spop %974 }
 0x495   :  { %s681_s15 = ssub.f32 0.0, %s975_s2 }
 0x497   :  { %s682_s16 = smul.f32 0.083333336, %s681_s15 }
 0x499   :  { %684 = sst [smem:[#allocation2]] %s682_s16 }
 0x49a   :  { %1018 = shalt.err (!%p1015_p2)
}
 0x49b   :  { %s1037_s24 = smov [#allocation2]   ;;  %s1019_s0 = scalar_lea.hbm %s1413_s6, 16 }
 0x49c   :  { %770 = dma.smem_to_hbm %s1037_s24, 16, %s1412_s5, [#allocation3]  }
 0x49d   :  { %p1020_p3 = scmp.ne.s32.totalorder %s1413_s6, %s1019_s0  ;;  %p1023_p4 = scmp.lt.u32.totalorder %s1019_s0, %s1413_s6 }
 0x49f   :  { %p1025_p5 = pnand %p1023_p4, %p1020_p3 }
 0x4a2   :  { %s977_s27 = spop %976 }
 0x4a3   :  { %s760_s28 = smul.f32 0.083333336, %s977_s27 }
 0x4a5   :  { %762 = sst [smem:[#allocation4]] %s760_s28 }
 0x4a6   :  { %1028 = shalt.err (!%p1025_p5)
}
 0x4a7   :  { %s1038_s9 = smov [#allocation4]  }
 0x4a8   :  { %778 = dma.smem_to_hbm %s1038_s9, 16, %s1413_s6, [#allocation5]  }
 0x4a9   :  { %1029 = dma.done.wait [#allocation3], 16  }
 0x4aa   :  { %1030 = vsyncadd [#allocation3], 4294967280 }
 0x4ab   :  { %1031 = dma.done.wait [#allocation5], 16  }
 0x4ac   :  { %1032 = vsyncadd [#allocation5], 4294967280 }
 0x4ad   :  { %785 = sfence }
 0x4ae   :  { %786 = vsyncpa [#allocation3], 1 }
 0x4af   :  { %787 = vsyncpa [#allocation5], 1 }

</bundles_post_ra>
